<compile_context>
chip_gen: v7x
topology: tpu7x:2x2x1
jax: 0.10.0
libtpu: 0.0.40
codegen_flags: <defaults>
</compile_context>

<pallas_src>
import functools

import jax
import jax.numpy as jnp
import numpy as np
from jax.experimental import pallas as pl
from jax.experimental.pallas import tpu as pltpu


def _encoder_layer_kernel(x_ref, mask_ref,
                          wqkv_ref, bqkv_ref, wo_ref, bo_ref,
                          w1_ref, b1_ref, w2_ref, b2_ref,
                          g1_ref, be1_ref, g2_ref, be2_ref,
                          out_ref,
                          *, nhead, head_dim, head_dim_p, kv_chunk, mm_dtype):
    Bt, L, F = x_ref.shape
    H, d, dp = nhead, head_dim, head_dim_p
    cpb = 3 * dp                 # lane-aligned (q|k|v) column block per head
    G = H * Bt                   # attention problems per grid step (g = h*Bt + b)
    R = Bt * L                   # rows processed per grid step

    x2 = x_ref[...].reshape(R, F)                       # leading-dims reshape (free)

    # ---- fused Q|K|V projection: ONE MXU matmul against the head-blocked,
    #      lane-padded weight built in the wrapper ----
    qkv = jnp.dot(x2.astype(mm_dtype), wqkv_ref[...],
                  preferred_element_type=jnp.float32) + bqkv_ref[...]   # (R, H*3*dp)
    qkv3 = qkv.reshape(Bt, L, H * cpb)                  # leading split (free)

    # ---- head-major stack: one 128-ALIGNED lane slice per head + leading-axis stack
    #      (no unaligned lane slicing -> no XLU relayouts) ----
    hs = jnp.stack([qkv3[:, :, h * cpb:(h + 1) * cpb] for h in range(H)],
                   axis=0).reshape(G, L, cpb)           # (G, L, 3*dp)
    scale = d ** -0.5                                   # fold 1/sqrt(d) into q once
    qh = (hs[:, :, :dp] * scale).astype(mm_dtype)
    kh = hs[:, :, dp:2 * dp].astype(mm_dtype)
    vh = hs[:, :, 2 * dp:].astype(mm_dtype)

    # ---- loop-invariant additive padding bias (1.0 in mask == padded key) ----
    bias = jnp.where(mask_ref[...] > 0.5, -1e9, 0.0)                    # (Bt, 1, L)
    bias = jnp.broadcast_to(bias[None], (H, Bt, 1, L)).reshape(G, 1, L)

    # ---- flash-style online softmax over KV chunks: scores working set bounded to
    #      (G, L, kv_chunk) instead of (G, L, L) ----
    m_i = jnp.full((G, L, 1), -1e30, jnp.float32)
    l_i = jnp.zeros((G, L, 1), jnp.float32)
    acc = jnp.zeros((G, L, dp), jnp.float32)
    for c in range(L // kv_chunk):                      # static trip count; unrolls
        c0 = c * kv_chunk
        k_c = kh[:, c0:c0 + kv_chunk, :]
        v_c = vh[:, c0:c0 + kv_chunk, :]
        s = jnp.einsum('gqd,gkd->gqk', qh, k_c,
                       preferred_element_type=jnp.float32) \
            + bias[:, :, c0:c0 + kv_chunk]                              # (G, L, kc)
        m_new = jnp.maximum(m_i, jnp.max(s, axis=-1, keepdims=True))
        alpha = jnp.exp(m_i - m_new)
        p = jnp.exp(s - m_new)
        l_i = alpha * l_i + jnp.sum(p, axis=-1, keepdims=True)
        acc = alpha * acc + jnp.einsum('gqk,gkd->gqd', p.astype(mm_dtype), v_c,
                                       preferred_element_type=jnp.float32)
        m_i = m_new
    o = acc * pl.reciprocal(l_i, approx=True)                           # (G, L, dp)

    # ---- heads back onto (128-aligned) lanes, then ONE full-depth output projection
    #      (contraction H*dp instead of H shallow depth-d matmuls) + residual ----
    o_rows = jnp.concatenate(
        [o[h * Bt:(h + 1) * Bt].reshape(R, dp) for h in range(H)], axis=1)  # (R, H*dp)
    y = x2 + bo_ref[...] + jnp.dot(o_rows.astype(mm_dtype), wo_ref[...],
                                   preferred_element_type=jnp.float32)

    # ---- LayerNorm (eps=1e-9 per module spec); single-pass variance, rsqrt on EUP ----
    def layer_norm(t, g_ref, b_ref):
        mu = jnp.mean(t, axis=-1, keepdims=True)
        var = jnp.maximum(jnp.mean(t * t, axis=-1, keepdims=True) - mu * mu, 0.0)
        return (t - mu) * jax.lax.rsqrt(var + 1e-9) * g_ref[...] + b_ref[...]

    yn = layer_norm(y, g1_ref, be1_ref)

    # ---- feed-forward: Linear -> ReLU -> Linear, residual ----
    # TODO(synk): dropout (p=0.1) has no deterministic eval-time effect; identity here.
    h1 = jnp.maximum(
        jnp.dot(yn.astype(mm_dtype), w1_ref[...],
                preferred_element_type=jnp.float32) + b1_ref[...], 0.0)
    z = yn + jnp.dot(h1.astype(mm_dtype), w2_ref[...],
                     preferred_element_type=jnp.float32) + b2_ref[...]

    out_ref[...] = layer_norm(z, g2_ref, be2_ref).reshape(Bt, L, F)


def _pad_head_cols(w, nhead, d, dp):
    """(..., H*d) grouped (h, j) on the last axis -> (..., H, dp), zero-padded per head."""
    lead = w.shape[:-1]
    w = w.reshape(*lead, nhead, d)
    pad = [(0, 0)] * (len(lead) + 1) + [(0, dp - d)]
    return jnp.pad(w, pad)


def transformer_encoder_layer(feats, mask, params, *, nhead, block_b=1, kv_chunk=None,
                              matmul_dtype=jnp.bfloat16):
    """feats: (B, L, F) f32; mask: (B, 1, L) f32 (1.0 = padded key position).

    block_b: batch items per grid step.  Keep B // block_b >= 2 on v7x (two TensorCores
    share the parallel grid axis); raise block_b on v5e/v6e to amortize per-step cost.
    kv_chunk: KV tile length for the online softmax (None = full L in one chunk).
    """
    B, L, F = feats.shape
    DF = params["w1"].shape[1]
    assert F % nhead == 0 and B % block_b == 0
    d = F // nhead
    dp = ((d + 127) // 128) * 128            # lane-aligned (padded) head_dim
    if kv_chunk is None:
        kv_chunk = L
    assert L % kv_chunk == 0

    mmd = matmul_dtype
    # Head-blocked fused Q|K|V weight: per head a contiguous, 128-aligned column block
    # [q(dp) | k(dp) | v(dp)]; padded columns (and padded Wo rows below) are zero so
    # they contribute nothing to scores / outputs.  Matmul weights cast to MXU dtype.
    wq = _pad_head_cols(params["wq"], nhead, d, dp)          # (F, H, dp)
    wk = _pad_head_cols(params["wk"], nhead, d, dp)
    wv = _pad_head_cols(params["wv"], nhead, d, dp)
    w_qkv = jnp.stack([wq, wk, wv], axis=2).reshape(F, nhead * 3 * dp).astype(mmd)
    bq = _pad_head_cols(params["bq"], nhead, d, dp)          # (1, H, dp)
    bk = _pad_head_cols(params["bk"], nhead, d, dp)
    bv = _pad_head_cols(params["bv"], nhead, d, dp)
    b_qkv = jnp.stack([bq, bk, bv], axis=2).reshape(1, nhead * 3 * dp)
    wo_p = jnp.pad(params["wo"].reshape(nhead, d, F),
                   ((0, 0), (0, dp - d), (0, 0))).reshape(nhead * dp, F).astype(mmd)
    w1 = params["w1"].astype(mmd)
    w2 = params["w2"].astype(mmd)

    # Grid-invariant operands (constant index_map): single-buffered -> ~2x less
    # resident weight VMEM than the default double-buffering.
    def full_spec(shape):
        return pl.BlockSpec(shape, lambda i: (0,) * len(shape),
                            pipeline_mode=pl.Buffered(1))

    in_specs = [
        pl.BlockSpec((block_b, L, F), lambda i: (i, 0, 0)),   # feats
        pl.BlockSpec((block_b, 1, L), lambda i: (i, 0, 0)),   # key-padding mask
        full_spec((F, nhead * 3 * dp)), full_spec((1, nhead * 3 * dp)),  # Wqkv, bqkv
        full_spec((nhead * dp, F)), full_spec((1, F)),        # Wo (padded rows), bo
        full_spec((F, DF)), full_spec((1, DF)),               # W1, b1
        full_spec((DF, F)), full_spec((1, F)),                # W2, b2
        full_spec((1, F)), full_spec((1, F)),                 # ln1 gamma, beta
        full_spec((1, F)), full_spec((1, F)),                 # ln2 gamma, beta
    ]

    # Explicit scoped-VMEM budget: single-buffered weights + double-buffered activation
    # blocks + chunked scores, with headroom, capped for v7x (64 MiB physical VMEM).
    f32b, mmb = 4, jnp.dtype(mmd).itemsize
    G, R = block_b * nhead, block_b * L
    weight_bytes = (w_qkv.size + wo_p.size + w1.size + w2.size) * mmb \
                 + (b_qkv.size + 6 * F + DF) * f32b
    io_bytes = 2 * 2 * block_b * L * F * f32b
    act_bytes = (2 * R * 3 * nhead * dp + 3 * G * L * kv_chunk + 2 * G * L * dp
                 + R * (nhead * dp + DF + 6 * F)) * f32b
    vmem_limit = int(min(max(1.25 * (weight_bytes + io_bytes + act_bytes),
                             16 * 1024 * 1024), 64 * 1024 * 1024))

    kernel = functools.partial(_encoder_layer_kernel, nhead=nhead, head_dim=d,
                               head_dim_p=dp, kv_chunk=kv_chunk, mm_dtype=mmd)
    return pl.pallas_call(
        kernel,
        out_shape=jax.ShapeDtypeStruct((B, L, F), jnp.float32),
        grid_spec=pltpu.PrefetchScalarGridSpec(
            num_scalar_prefetch=0,
            grid=(B // block_b,),
            in_specs=in_specs,
            out_specs=pl.BlockSpec((block_b, L, F), lambda i: (i, 0, 0)),
        ),
        compiler_params=pltpu.CompilerParams(
            dimension_semantics=("parallel",),
            vmem_limit_bytes=vmem_limit),
    )(feats, mask, w_qkv, b_qkv, wo_p, params["bo"], w1, params["b1"],
      w2, params["b2"], params["g1"], params["be1"], params["g2"], params["be2"])


def _reference(feats, mask, params, nhead):
    """Pure-JAX reference mirroring the PyTorch forward (eval mode)."""
    B, L, F = feats.shape
    d = F // nhead

    def lin(x, w, b):
        return x @ w + b

    q = lin(feats, params["wq"], params["bq"]).reshape(B, L, nhead, d).transpose(0, 2, 1, 3)
    k = lin(feats, params["wk"], params["bk"]).reshape(B, L, nhead, d).transpose(0, 2, 1, 3)
    v = lin(feats, params["wv"], params["bv"]).reshape(B, L, nhead, d).transpose(0, 2, 1, 3)
    scores = (d ** -0.5) * jnp.einsum("bhqd,bhkd->bhqk", q, k)
    pad = mask[:, None, :, :] > 0.5            # (B,1,1,L)
    scores = jnp.where(pad, -1e9, scores)
    p = jax.nn.softmax(scores, axis=-1)
    att = jnp.einsum("bhqk,bhkd->bhqd", p, v).transpose(0, 2, 1, 3).reshape(B, L, F)
    y = lin(att, params["wo"], params["bo"]) + feats

    def ln(x, g, b):
        mu = x.mean(-1, keepdims=True)
        var = ((x - mu) ** 2).mean(-1, keepdims=True)
        return (x - mu) / jnp.sqrt(var + 1e-9) * g + b

    yn = ln(y, params["g1"], params["be1"])
    ff = lin(jnp.maximum(lin(yn, params["w1"], params["b1"]), 0.0), params["w2"], params["b2"])
    return ln(yn + ff, params["g2"], params["be2"])


if __name__ == "__main__":
    # Small shapes: batch=2, seq=8, d_model=32, nhead=4, dim_feedforward=64
    B, L, F, NH, DF = 2, 8, 32, 4, 64

    key = jax.random.PRNGKey(0)
    keys = jax.random.split(key, 16)
    init = lambda k, shape: (0.1 * jax.random.normal(k, shape)).astype(jnp.float32)

    params = {
        "wq": init(keys[0], (F, F)),  "bq": init(keys[1], (1, F)),
        "wk": init(keys[2], (F, F)),  "bk": init(keys[3], (1, F)),
        "wv": init(keys[4], (F, F)),  "bv": init(keys[5], (1, F)),
        "wo": init(keys[6], (F, F)),  "bo": init(keys[7], (1, F)),
        "w1": init(keys[8], (F, DF)), "b1": init(keys[9], (1, DF)),
        "w2": init(keys[10], (DF, F)), "b2": init(keys[11], (1, F)),
        "g1": jnp.ones((1, F), jnp.float32),  "be1": jnp.zeros((1, F), jnp.float32),
        "g2": jnp.ones((1, F), jnp.float32),  "be2": jnp.zeros((1, F), jnp.float32),
    }

    feats = jax.random.normal(keys[12], (B, L, F), dtype=jnp.float32)
    # src_key_padding_mask: pad the last two positions of batch 1
    mask_np = np.zeros((B, 1, L), dtype=np.float32)
    mask_np[1, 0, -2:] = 1.0
    mask = jnp.asarray(mask_np)

    ref = _reference(feats, mask, params, NH)

    # Default path: bf16 MXU operands, f32 accumulation / softmax / LayerNorm.
    out = jax.block_until_ready(
        transformer_encoder_layer(feats, mask, params, nhead=NH))
    np.testing.assert_allclose(np.asarray(out), np.asarray(ref), rtol=5e-2, atol=5e-2)

    # f32 matmul path (tolerance covers the approx-reciprocal softmax + 1-pass LN).
    out_f32 = jax.block_until_ready(
        transformer_encoder_layer(feats, mask, params, nhead=NH,
                                  matmul_dtype=jnp.float32))
    np.testing.assert_allclose(np.asarray(out_f32), np.asarray(ref), rtol=2e-3, atol=2e-3)

    # KV-chunked online softmax path (flash-style; bounds scores VMEM at large L).
    out_kv = jax.block_until_ready(
        transformer_encoder_layer(feats, mask, params, nhead=NH, kv_chunk=4,
                                  matmul_dtype=jnp.float32))
    np.testing.assert_allclose(np.asarray(out_kv), np.asarray(ref), rtol=2e-3, atol=2e-3)

    # Multiple batch items per grid step (v5e/v6e-style larger per-step blocks).
    out_blk = jax.block_until_ready(
        transformer_encoder_layer(feats, mask, params, nhead=NH, block_b=2,
                                  matmul_dtype=jnp.float32))
    np.testing.assert_allclose(np.asarray(out_blk), np.asarray(ref), rtol=2e-3, atol=2e-3)

    print("KERNEL_OK")
</pallas_src>

<mosaic_0001>
module attributes {stable_mosaic.version = 11 : i64} {
  func.func @_encoder_layer_kernel(%arg0: i32, %arg1: memref<1x8x32xf32, #tpu.memory_space<vmem>>, %arg2: memref<1x1x8xf32, #tpu.memory_space<vmem>>, %arg3: memref<32x1536xbf16, #tpu.memory_space<vmem>>, %arg4: memref<1x1536xf32, #tpu.memory_space<vmem>>, %arg5: memref<512x32xbf16, #tpu.memory_space<vmem>>, %arg6: memref<1x32xf32, #tpu.memory_space<vmem>>, %arg7: memref<32x64xbf16, #tpu.memory_space<vmem>>, %arg8: memref<1x64xf32, #tpu.memory_space<vmem>>, %arg9: memref<64x32xbf16, #tpu.memory_space<vmem>>, %arg10: memref<1x32xf32, #tpu.memory_space<vmem>>, %arg11: memref<1x32xf32, #tpu.memory_space<vmem>>, %arg12: memref<1x32xf32, #tpu.memory_space<vmem>>, %arg13: memref<1x32xf32, #tpu.memory_space<vmem>>, %arg14: memref<1x32xf32, #tpu.memory_space<vmem>>, %arg15: memref<1x8x32xf32, #tpu.memory_space<vmem>>) attributes {dimension_semantics = [#tpu.dimension_semantics<parallel>], iteration_bounds = array<i64: 2>, scalar_prefetch = 0 : i64, scratch_operands = 0 : i64, tpu.core_type = #tpu.core_type<tc>, window_params = [{transform_indices = @transform_0, window_bounds = array<i64: 1, 8, 32>}, {transform_indices = @transform_1, window_bounds = array<i64: 1, 1, 8>}, {pipeline_mode = #tpu.pipeline_mode<synchronous>, transform_indices = @transform_2, window_bounds = array<i64: 32, 1536>}, {pipeline_mode = #tpu.pipeline_mode<synchronous>, transform_indices = @transform_3, window_bounds = array<i64: 1, 1536>}, {pipeline_mode = #tpu.pipeline_mode<synchronous>, transform_indices = @transform_4, window_bounds = array<i64: 512, 32>}, {pipeline_mode = #tpu.pipeline_mode<synchronous>, transform_indices = @transform_5, window_bounds = array<i64: 1, 32>}, {pipeline_mode = #tpu.pipeline_mode<synchronous>, transform_indices = @transform_6, window_bounds = array<i64: 32, 64>}, {pipeline_mode = #tpu.pipeline_mode<synchronous>, transform_indices = @transform_7, window_bounds = array<i64: 1, 64>}, {pipeline_mode = #tpu.pipeline_mode<synchronous>, transform_indices = @transform_8, window_bounds = array<i64: 64, 32>}, {pipeline_mode = #tpu.pipeline_mode<synchronous>, transform_indices = @transform_9, window_bounds = array<i64: 1, 32>}, {pipeline_mode = #tpu.pipeline_mode<synchronous>, transform_indices = @transform_10, window_bounds = array<i64: 1, 32>}, {pipeline_mode = #tpu.pipeline_mode<synchronous>, transform_indices = @transform_11, window_bounds = array<i64: 1, 32>}, {pipeline_mode = #tpu.pipeline_mode<synchronous>, transform_indices = @transform_12, window_bounds = array<i64: 1, 32>}, {pipeline_mode = #tpu.pipeline_mode<synchronous>, transform_indices = @transform_13, window_bounds = array<i64: 1, 32>}, {transform_indices = @transform_14, window_bounds = array<i64: 1, 8, 32>}]} {
    %c0 = arith.constant 0 : index
    %c0_0 = arith.constant 0 : index
    %c0_1 = arith.constant 0 : index
    %0 = vector.load %arg1[%c0, %c0_0, %c0_1] : memref<1x8x32xf32, #tpu.memory_space<vmem>>, vector<1x8x32xf32>
    %1 = vector.shape_cast %0 : vector<1x8x32xf32> to vector<8x32xf32>
    %2 = arith.truncf %1 : vector<8x32xf32> to vector<8x32xbf16>
    %c0_2 = arith.constant 0 : index
    %c0_3 = arith.constant 0 : index
    %3 = vector.load %arg3[%c0_2, %c0_3] : memref<32x1536xbf16, #tpu.memory_space<vmem>>, vector<32x1536xbf16>
    %cst = arith.constant dense<0.000000e+00> : vector<8x1536xf32>
    %4 = tpu.matmul %2, %3, %cst {dimension_numbers = #tpu.dot_dimension_numbers<[1], [0], [0], [1], [0, 0, 1, 1], [], []>} : vector<8x32xbf16>, vector<32x1536xbf16>, vector<8x1536xf32> -> vector<8x1536xf32>
    %c0_4 = arith.constant 0 : index
    %c0_5 = arith.constant 0 : index
    %5 = vector.load %arg4[%c0_4, %c0_5] : memref<1x1536xf32, #tpu.memory_space<vmem>>, vector<1x1536xf32>
    %6 = vector.broadcast %5 : vector<1x1536xf32> to vector<8x1536xf32>
    %7 = arith.addf %4, %6 : vector<8x1536xf32>
    %8 = vector.shape_cast %7 : vector<8x1536xf32> to vector<1x8x1536xf32>
    %9 = vector.extract_strided_slice %8 {offsets = [0, 0, 0], sizes = [1, 8, 384], strides = [1, 1, 1]} : vector<1x8x1536xf32> to vector<1x8x384xf32>
    %10 = vector.extract_strided_slice %8 {offsets = [0, 0, 384], sizes = [1, 8, 384], strides = [1, 1, 1]} : vector<1x8x1536xf32> to vector<1x8x384xf32>
    %11 = vector.extract_strided_slice %8 {offsets = [0, 0, 768], sizes = [1, 8, 384], strides = [1, 1, 1]} : vector<1x8x1536xf32> to vector<1x8x384xf32>
    %12 = vector.extract_strided_slice %8 {offsets = [0, 0, 1152], sizes = [1, 8, 384], strides = [1, 1, 1]} : vector<1x8x1536xf32> to vector<1x8x384xf32>
    %13 = vector.shape_cast %9 : vector<1x8x384xf32> to vector<1x1x8x384xf32>
    %14 = vector.shape_cast %10 : vector<1x8x384xf32> to vector<1x1x8x384xf32>
    %15 = vector.shape_cast %11 : vector<1x8x384xf32> to vector<1x1x8x384xf32>
    %16 = vector.shape_cast %12 : vector<1x8x384xf32> to vector<1x1x8x384xf32>
    %17 = tpu.concatenate %13, %14, %15, %16 in 0 : vector<1x1x8x384xf32>, vector<1x1x8x384xf32>, vector<1x1x8x384xf32>, vector<1x1x8x384xf32> -> vector<4x1x8x384xf32>
    %18 = vector.shape_cast %17 : vector<4x1x8x384xf32> to vector<4x8x384xf32>
    %19 = vector.extract_strided_slice %18 {offsets = [0, 0, 0], sizes = [4, 8, 128], strides = [1, 1, 1]} : vector<4x8x384xf32> to vector<4x8x128xf32>
    %cst_6 = arith.constant 0.353553385 : f32
    %20 = vector.broadcast %cst_6 : f32 to vector<4x8x128xf32>
    %21 = arith.mulf %19, %20 : vector<4x8x128xf32>
    %22 = arith.truncf %21 : vector<4x8x128xf32> to vector<4x8x128xbf16>
    %23 = vector.extract_strided_slice %18 {offsets = [0, 0, 128], sizes = [4, 8, 128], strides = [1, 1, 1]} : vector<4x8x384xf32> to vector<4x8x128xf32>
    %24 = arith.truncf %23 : vector<4x8x128xf32> to vector<4x8x128xbf16>
    %25 = vector.extract_strided_slice %18 {offsets = [0, 0, 256], sizes = [4, 8, 128], strides = [1, 1, 1]} : vector<4x8x384xf32> to vector<4x8x128xf32>
    %26 = arith.truncf %25 : vector<4x8x128xf32> to vector<4x8x128xbf16>
    %c0_7 = arith.constant 0 : index
    %c0_8 = arith.constant 0 : index
    %c0_9 = arith.constant 0 : index
    %27 = vector.load %arg2[%c0_7, %c0_8, %c0_9] : memref<1x1x8xf32, #tpu.memory_space<vmem>>, vector<1x1x8xf32>
    %cst_10 = arith.constant 5.000000e-01 : f32
    %28 = vector.broadcast %cst_10 : f32 to vector<1x1x8xf32>
    %29 = arith.cmpf ogt, %27, %28 : vector<1x1x8xf32>
    %cst_11 = arith.constant -1.000000e+09 : f32
    %cst_12 = arith.constant 0.000000e+00 : f32
    %30 = vector.broadcast %cst_11 : f32 to vector<1x1x8xf32>
    %31 = vector.broadcast %cst_12 : f32 to vector<1x1x8xf32>
    %32 = arith.select %29, %30, %31 : vector<1x1x8xi1>, vector<1x1x8xf32>
    %33 = vector.shape_cast %32 : vector<1x1x8xf32> to vector<1x1x1x8xf32>
    %34 = vector.shape_cast %33 : vector<1x1x1x8xf32> to vector<1x1x1x8xf32>
    %35 = vector.broadcast %34 : vector<1x1x1x8xf32> to vector<4x1x1x8xf32>
    %36 = vector.shape_cast %35 : vector<4x1x1x8xf32> to vector<4x1x8xf32>
    %cst_13 = arith.constant -1.000000e+30 : f32
    %37 = vector.broadcast %cst_13 : f32 to vector<4x8x1xf32>
    %cst_14 = arith.constant 0.000000e+00 : f32
    %38 = vector.broadcast %cst_14 : f32 to vector<4x8x1xf32>
    %cst_15 = arith.constant 0.000000e+00 : f32
    %39 = vector.broadcast %cst_15 : f32 to vector<4x8x128xf32>
    "tpu.trace_start"() <{level = 10 : i32, message = "gqd,gkd->gqk"}> : () -> ()
    %cst_16 = arith.constant dense<0.000000e+00> : vector<4x8x8xf32>
    %40 = tpu.matmul %22, %24, %cst_16 {dimension_numbers = #tpu.dot_dimension_numbers<[2], [2], [1], [1], [0, 0, 0, 1, 1, 1], [0], [0]>} : vector<4x8x128xbf16>, vector<4x8x128xbf16>, vector<4x8x8xf32> -> vector<4x8x8xf32>
    "tpu.trace_stop"() : () -> ()
    %41 = vector.broadcast %36 : vector<4x1x8xf32> to vector<4x8x8xf32>
    %42 = arith.addf %40, %41 : vector<4x8x8xf32>
    %cst_17 = arith.constant dense<0xFF800000> : vector<4x8xf32>
    %43 = vector.multi_reduction <maximumf>, %42, %cst_17 [2] : vector<4x8x8xf32> to vector<4x8xf32>
    %44 = vector.shape_cast %43 : vector<4x8xf32> to vector<4x8x1xf32>
    %45 = arith.maximumf %37, %44 : vector<4x8x1xf32>
    %46 = arith.subf %37, %45 : vector<4x8x1xf32>
    %47 = math.exp %46 : vector<4x8x1xf32>
    %48 = vector.broadcast %45 : vector<4x8x1xf32> to vector<4x8x8xf32>
    %49 = arith.subf %42, %48 : vector<4x8x8xf32>
    %50 = math.exp %49 : vector<4x8x8xf32>
    %51 = arith.mulf %47, %38 : vector<4x8x1xf32>
    %cst_18 = arith.constant dense<0.000000e+00> : vector<4x8xf32>
    %52 = vector.multi_reduction <add>, %50, %cst_18 [2] : vector<4x8x8xf32> to vector<4x8xf32>
    %53 = vector.shape_cast %52 : vector<4x8xf32> to vector<4x8x1xf32>
    %54 = arith.addf %51, %53 : vector<4x8x1xf32>
    %55 = vector.broadcast %47 : vector<4x8x1xf32> to vector<4x8x128xf32>
    %56 = arith.mulf %55, %39 : vector<4x8x128xf32>
    %57 = arith.truncf %50 : vector<4x8x8xf32> to vector<4x8x8xbf16>
    "tpu.trace_start"() <{level = 10 : i32, message = "gqk,gkd->gqd"}> : () -> ()
    %cst_19 = arith.constant dense<0.000000e+00> : vector<4x8x128xf32>
    %58 = tpu.matmul %57, %26, %cst_19 {dimension_numbers = #tpu.dot_dimension_numbers<[2], [1], [1], [2], [0, 0, 0, 1, 1, 2], [0], [0]>} : vector<4x8x8xbf16>, vector<4x8x128xbf16>, vector<4x8x128xf32> -> vector<4x8x128xf32>
    "tpu.trace_stop"() : () -> ()
    %59 = arith.addf %56, %58 : vector<4x8x128xf32>
    %60 = tpu.reciprocal %54 {approx = true} : vector<4x8x1xf32> -> vector<4x8x1xf32>
    %61 = vector.broadcast %60 : vector<4x8x1xf32> to vector<4x8x128xf32>
    %62 = arith.mulf %59, %61 : vector<4x8x128xf32>
    %63 = vector.extract_strided_slice %62 {offsets = [0, 0, 0], sizes = [1, 8, 128], strides = [1, 1, 1]} : vector<4x8x128xf32> to vector<1x8x128xf32>
    %64 = vector.shape_cast %63 : vector<1x8x128xf32> to vector<8x128xf32>
    %65 = vector.extract_strided_slice %62 {offsets = [1, 0, 0], sizes = [1, 8, 128], strides = [1, 1, 1]} : vector<4x8x128xf32> to vector<1x8x128xf32>
    %66 = vector.shape_cast %65 : vector<1x8x128xf32> to vector<8x128xf32>
    %67 = vector.extract_strided_slice %62 {offsets = [2, 0, 0], sizes = [1, 8, 128], strides = [1, 1, 1]} : vector<4x8x128xf32> to vector<1x8x128xf32>
    %68 = vector.shape_cast %67 : vector<1x8x128xf32> to vector<8x128xf32>
    %69 = vector.extract_strided_slice %62 {offsets = [3, 0, 0], sizes = [1, 8, 128], strides = [1, 1, 1]} : vector<4x8x128xf32> to vector<1x8x128xf32>
    %70 = vector.shape_cast %69 : vector<1x8x128xf32> to vector<8x128xf32>
    %71 = tpu.concatenate %64, %66, %68, %70 in 1 : vector<8x128xf32>, vector<8x128xf32>, vector<8x128xf32>, vector<8x128xf32> -> vector<8x512xf32>
    %c0_20 = arith.constant 0 : index
    %c0_21 = arith.constant 0 : index
    %72 = vector.load %arg6[%c0_20, %c0_21] : memref<1x32xf32, #tpu.memory_space<vmem>>, vector<1x32xf32>
    %73 = vector.broadcast %72 : vector<1x32xf32> to vector<8x32xf32>
    %74 = arith.addf %1, %73 : vector<8x32xf32>
    %75 = arith.truncf %71 : vector<8x512xf32> to vector<8x512xbf16>
    %c0_22 = arith.constant 0 : index
    %c0_23 = arith.constant 0 : index
    %76 = vector.load %arg5[%c0_22, %c0_23] : memref<512x32xbf16, #tpu.memory_space<vmem>>, vector<512x32xbf16>
    %cst_24 = arith.constant dense<0.000000e+00> : vector<8x32xf32>
    %77 = tpu.matmul %75, %76, %cst_24 {dimension_numbers = #tpu.dot_dimension_numbers<[1], [0], [0], [1], [0, 0, 1, 1], [], []>} : vector<8x512xbf16>, vector<512x32xbf16>, vector<8x32xf32> -> vector<8x32xf32>
    %78 = arith.addf %74, %77 : vector<8x32xf32>
    %cst_25 = arith.constant dense<0.000000e+00> : vector<8xf32>
    %79 = vector.multi_reduction <add>, %78, %cst_25 [1] : vector<8x32xf32> to vector<8xf32>
    %80 = vector.shape_cast %79 : vector<8xf32> to vector<8x1xf32>
    %cst_26 = arith.constant 3.200000e+01 : f32
    %81 = vector.broadcast %cst_26 : f32 to vector<8x1xf32>
    %82 = arith.divf %80, %81 : vector<8x1xf32>
    %83 = arith.mulf %78, %78 : vector<8x32xf32>
    %cst_27 = arith.constant dense<0.000000e+00> : vector<8xf32>
    %84 = vector.multi_reduction <add>, %83, %cst_27 [1] : vector<8x32xf32> to vector<8xf32>
    %85 = vector.shape_cast %84 : vector<8xf32> to vector<8x1xf32>
    %cst_28 = arith.constant 3.200000e+01 : f32
    %86 = vector.broadcast %cst_28 : f32 to vector<8x1xf32>
    %87 = arith.divf %85, %86 : vector<8x1xf32>
    %88 = arith.mulf %82, %82 : vector<8x1xf32>
    %89 = arith.subf %87, %88 : vector<8x1xf32>
    %cst_29 = arith.constant 0.000000e+00 : f32
    %90 = vector.broadcast %cst_29 : f32 to vector<8x1xf32>
    %91 = arith.maximumf %89, %90 : vector<8x1xf32>
    %92 = vector.broadcast %82 : vector<8x1xf32> to vector<8x32xf32>
    %93 = arith.subf %78, %92 : vector<8x32xf32>
    %cst_30 = arith.constant 9.99999971E-10 : f32
    %94 = vector.broadcast %cst_30 : f32 to vector<8x1xf32>
    %95 = arith.addf %91, %94 : vector<8x1xf32>
    %96 = math.rsqrt %95 : vector<8x1xf32>
    %97 = vector.broadcast %96 : vector<8x1xf32> to vector<8x32xf32>
    %98 = arith.mulf %93, %97 : vector<8x32xf32>
    %c0_31 = arith.constant 0 : index
    %c0_32 = arith.constant 0 : index
    %99 = vector.load %arg11[%c0_31, %c0_32] : memref<1x32xf32, #tpu.memory_space<vmem>>, vector<1x32xf32>
    %100 = vector.broadcast %99 : vector<1x32xf32> to vector<8x32xf32>
    %101 = arith.mulf %98, %100 : vector<8x32xf32>
    %c0_33 = arith.constant 0 : index
    %c0_34 = arith.constant 0 : index
    %102 = vector.load %arg12[%c0_33, %c0_34] : memref<1x32xf32, #tpu.memory_space<vmem>>, vector<1x32xf32>
    %103 = vector.broadcast %102 : vector<1x32xf32> to vector<8x32xf32>
    %104 = arith.addf %101, %103 : vector<8x32xf32>
    %105 = arith.truncf %104 : vector<8x32xf32> to vector<8x32xbf16>
    %c0_35 = arith.constant 0 : index
    %c0_36 = arith.constant 0 : index
    %106 = vector.load %arg7[%c0_35, %c0_36] : memref<32x64xbf16, #tpu.memory_space<vmem>>, vector<32x64xbf16>
    %cst_37 = arith.constant dense<0.000000e+00> : vector<8x64xf32>
    %107 = tpu.matmul %105, %106, %cst_37 {dimension_numbers = #tpu.dot_dimension_numbers<[1], [0], [0], [1], [0, 0, 1, 1], [], []>} : vector<8x32xbf16>, vector<32x64xbf16>, vector<8x64xf32> -> vector<8x64xf32>
    %c0_38 = arith.constant 0 : index
    %c0_39 = arith.constant 0 : index
    %108 = vector.load %arg8[%c0_38, %c0_39] : memref<1x64xf32, #tpu.memory_space<vmem>>, vector<1x64xf32>
    %109 = vector.broadcast %108 : vector<1x64xf32> to vector<8x64xf32>
    %110 = arith.addf %107, %109 : vector<8x64xf32>
    %cst_40 = arith.constant 0.000000e+00 : f32
    %111 = vector.broadcast %cst_40 : f32 to vector<8x64xf32>
    %112 = arith.maximumf %110, %111 : vector<8x64xf32>
    %113 = arith.truncf %112 : vector<8x64xf32> to vector<8x64xbf16>
    %c0_41 = arith.constant 0 : index
    %c0_42 = arith.constant 0 : index
    %114 = vector.load %arg9[%c0_41, %c0_42] : memref<64x32xbf16, #tpu.memory_space<vmem>>, vector<64x32xbf16>
    %cst_43 = arith.constant dense<0.000000e+00> : vector<8x32xf32>
    %115 = tpu.matmul %113, %114, %cst_43 {dimension_numbers = #tpu.dot_dimension_numbers<[1], [0], [0], [1], [0, 0, 1, 1], [], []>} : vector<8x64xbf16>, vector<64x32xbf16>, vector<8x32xf32> -> vector<8x32xf32>
    %116 = arith.addf %104, %115 : vector<8x32xf32>
    %c0_44 = arith.constant 0 : index
    %c0_45 = arith.constant 0 : index
    %117 = vector.load %arg10[%c0_44, %c0_45] : memref<1x32xf32, #tpu.memory_space<vmem>>, vector<1x32xf32>
    %118 = vector.broadcast %117 : vector<1x32xf32> to vector<8x32xf32>
    %119 = arith.addf %116, %118 : vector<8x32xf32>
    %cst_46 = arith.constant dense<0.000000e+00> : vector<8xf32>
    %120 = vector.multi_reduction <add>, %119, %cst_46 [1] : vector<8x32xf32> to vector<8xf32>
    %121 = vector.shape_cast %120 : vector<8xf32> to vector<8x1xf32>
    %cst_47 = arith.constant 3.200000e+01 : f32
    %122 = vector.broadcast %cst_47 : f32 to vector<8x1xf32>
    %123 = arith.divf %121, %122 : vector<8x1xf32>
    %124 = arith.mulf %119, %119 : vector<8x32xf32>
    %cst_48 = arith.constant dense<0.000000e+00> : vector<8xf32>
    %125 = vector.multi_reduction <add>, %124, %cst_48 [1] : vector<8x32xf32> to vector<8xf32>
    %126 = vector.shape_cast %125 : vector<8xf32> to vector<8x1xf32>
    %cst_49 = arith.constant 3.200000e+01 : f32
    %127 = vector.broadcast %cst_49 : f32 to vector<8x1xf32>
    %128 = arith.divf %126, %127 : vector<8x1xf32>
    %129 = arith.mulf %123, %123 : vector<8x1xf32>
    %130 = arith.subf %128, %129 : vector<8x1xf32>
    %cst_50 = arith.constant 0.000000e+00 : f32
    %131 = vector.broadcast %cst_50 : f32 to vector<8x1xf32>
    %132 = arith.maximumf %130, %131 : vector<8x1xf32>
    %133 = vector.broadcast %123 : vector<8x1xf32> to vector<8x32xf32>
    %134 = arith.subf %119, %133 : vector<8x32xf32>
    %cst_51 = arith.constant 9.99999971E-10 : f32
    %135 = vector.broadcast %cst_51 : f32 to vector<8x1xf32>
    %136 = arith.addf %132, %135 : vector<8x1xf32>
    %137 = math.rsqrt %136 : vector<8x1xf32>
    %138 = vector.broadcast %137 : vector<8x1xf32> to vector<8x32xf32>
    %139 = arith.mulf %134, %138 : vector<8x32xf32>
    %c0_52 = arith.constant 0 : index
    %c0_53 = arith.constant 0 : index
    %140 = vector.load %arg13[%c0_52, %c0_53] : memref<1x32xf32, #tpu.memory_space<vmem>>, vector<1x32xf32>
    %141 = vector.broadcast %140 : vector<1x32xf32> to vector<8x32xf32>
    %142 = arith.mulf %139, %141 : vector<8x32xf32>
    %c0_54 = arith.constant 0 : index
    %c0_55 = arith.constant 0 : index
    %143 = vector.load %arg14[%c0_54, %c0_55] : memref<1x32xf32, #tpu.memory_space<vmem>>, vector<1x32xf32>
    %144 = vector.broadcast %143 : vector<1x32xf32> to vector<8x32xf32>
    %145 = arith.addf %142, %144 : vector<8x32xf32>
    %146 = vector.shape_cast %145 : vector<8x32xf32> to vector<1x8x32xf32>
    %c0_56 = arith.constant 0 : index
    %c0_57 = arith.constant 0 : index
    %c0_58 = arith.constant 0 : index
    %147 = vector.load %arg15[%c0_56, %c0_57, %c0_58] : memref<1x8x32xf32, #tpu.memory_space<vmem>>, vector<1x8x32xf32>
    tpu.vector_store %arg15[%c0_56, %c0_57, %c0_58], %146 {strides = array<i32>} : memref<1x8x32xf32, #tpu.memory_space<vmem>>, vector<1x8x32xf32>,
    return
  }
  func.func @transform_0(%arg0: i32) -> (i32, i32, i32) {
    %c0_i32 = arith.constant 0 : i32
    %c0_i32_0 = arith.constant 0 : i32
    %c0_i32_1 = arith.constant 0 : i32
    return %arg0, %c0_i32, %c0_i32_0 : i32, i32, i32
  }
  func.func @transform_1(%arg0: i32) -> (i32, i32, i32) {
    %c0_i32 = arith.constant 0 : i32
    %c0_i32_0 = arith.constant 0 : i32
    %c0_i32_1 = arith.constant 0 : i32
    return %arg0, %c0_i32, %c0_i32_0 : i32, i32, i32
  }
  func.func @transform_2(%arg0: i32) -> (i32, i32) {
    %c0_i32 = arith.constant 0 : i32
    %c0_i32_0 = arith.constant 0 : i32
    %c0_i32_1 = arith.constant 0 : i32
    return %c0_i32, %c0_i32_0 : i32, i32
  }
  func.func @transform_3(%arg0: i32) -> (i32, i32) {
    %c0_i32 = arith.constant 0 : i32
    %c0_i32_0 = arith.constant 0 : i32
    %c0_i32_1 = arith.constant 0 : i32
    return %c0_i32, %c0_i32_0 : i32, i32
  }
  func.func @transform_4(%arg0: i32) -> (i32, i32) {
    %c0_i32 = arith.constant 0 : i32
    %c0_i32_0 = arith.constant 0 : i32
    %c0_i32_1 = arith.constant 0 : i32
    return %c0_i32, %c0_i32_0 : i32, i32
  }
  func.func @transform_5(%arg0: i32) -> (i32, i32) {
    %c0_i32 = arith.constant 0 : i32
    %c0_i32_0 = arith.constant 0 : i32
    %c0_i32_1 = arith.constant 0 : i32
    return %c0_i32, %c0_i32_0 : i32, i32
  }
  func.func @transform_6(%arg0: i32) -> (i32, i32) {
    %c0_i32 = arith.constant 0 : i32
    %c0_i32_0 = arith.constant 0 : i32
    %c0_i32_1 = arith.constant 0 : i32
    return %c0_i32, %c0_i32_0 : i32, i32
  }
  func.func @transform_7(%arg0: i32) -> (i32, i32) {
    %c0_i32 = arith.constant 0 : i32
    %c0_i32_0 = arith.constant 0 : i32
    %c0_i32_1 = arith.constant 0 : i32
    return %c0_i32, %c0_i32_0 : i32, i32
  }
  func.func @transform_8(%arg0: i32) -> (i32, i32) {
    %c0_i32 = arith.constant 0 : i32
    %c0_i32_0 = arith.constant 0 : i32
    %c0_i32_1 = arith.constant 0 : i32
    return %c0_i32, %c0_i32_0 : i32, i32
  }
  func.func @transform_9(%arg0: i32) -> (i32, i32) {
    %c0_i32 = arith.constant 0 : i32
    %c0_i32_0 = arith.constant 0 : i32
    %c0_i32_1 = arith.constant 0 : i32
    return %c0_i32, %c0_i32_0 : i32, i32
  }
  func.func @transform_10(%arg0: i32) -> (i32, i32) {
    %c0_i32 = arith.constant 0 : i32
    %c0_i32_0 = arith.constant 0 : i32
    %c0_i32_1 = arith.constant 0 : i32
    return %c0_i32, %c0_i32_0 : i32, i32
  }
  func.func @transform_11(%arg0: i32) -> (i32, i32) {
    %c0_i32 = arith.constant 0 : i32
    %c0_i32_0 = arith.constant 0 : i32
    %c0_i32_1 = arith.constant 0 : i32
    return %c0_i32, %c0_i32_0 : i32, i32
  }
  func.func @transform_12(%arg0: i32) -> (i32, i32) {
    %c0_i32 = arith.constant 0 : i32
    %c0_i32_0 = arith.constant 0 : i32
    %c0_i32_1 = arith.constant 0 : i32
    return %c0_i32, %c0_i32_0 : i32, i32
  }
  func.func @transform_13(%arg0: i32) -> (i32, i32) {
    %c0_i32 = arith.constant 0 : i32
    %c0_i32_0 = arith.constant 0 : i32
    %c0_i32_1 = arith.constant 0 : i32
    return %c0_i32, %c0_i32_0 : i32, i32
  }
  func.func @transform_14(%arg0: i32) -> (i32, i32, i32) {
    %c0_i32 = arith.constant 0 : i32
    %c0_i32_0 = arith.constant 0 : i32
    %c0_i32_1 = arith.constant 0 : i32
    return %arg0, %c0_i32, %c0_i32_0 : i32, i32, i32
  }
}

</mosaic_0001>

<bundles_post_ra>
// kernel: tpu_custom_call.1
= control target key start
LH: loop header
LB: loop body
LE: loop exit
PB: predicated region body
PF: predicated region fallthrough
CT: control target
= control target key end

     0   :  { %19 = vsyncpa [#allocation3], 0  ;;  %s2996_s0 = inlined_call_operand.vmem [shape: f32[2,8,32], index: 0, kind: input, shape index: {}]   ;;  %s2997_s1 = inlined_call_operand.vmem [shape: f32[2,1,8], index: 1, kind: input, shape index: {}]   ;;  %s2998_s2 = inlined_call_operand.vmem [shape: bf16[32,1536], index: 2, kind: input, shape index: {}]   ;;  %s2999_s3 = inlined_call_operand.vmem [shape: f32[1,1536], index: 3, kind: input, shape index: {}]   ;;  %s3000_s4 = inlined_call_operand.vmem [shape: bf16[512,32], index: 4, kind: input, shape index: {}]   ;;  %s3001_s5 = inlined_call_operand.vmem [shape: f32[1,32], index: 5, kind: input, shape index: {}]   ;;  %s3002_s6 = inlined_call_operand.vmem [shape: bf16[32,64], index: 6, kind: input, shape index: {}]   ;;  %s3003_s7 = inlined_call_operand.vmem [shape: f32[1,64], index: 7, kind: input, shape index: {}]   ;;  %s3004_s8 = inlined_call_operand.vmem [shape: bf16[64,32], index: 8, kind: input, shape index: {}]   ;;  %s3005_s9 = inlined_call_operand.vmem [shape: f32[1,32], index: 9, kind: input, shape index: {}]   ;;  %s3006_s10 = inlined_call_operand.vmem [shape: f32[1,32], index: 10, kind: input, shape index: {}]   ;;  %s3007_s11 = inlined_call_operand.vmem [shape: f32[1,32], index: 11, kind: input, shape index: {}]   ;;  %s3008_s12 = inlined_call_operand.vmem [shape: f32[1,32], index: 12, kind: input, shape index: {}]   ;;  %s3009_s13 = inlined_call_operand.vmem [shape: f32[1,32], index: 13, kind: input, shape index: {}]   ;;  %s3010_s14 = inlined_call_operand.hbm [shape: f32[2,8,32], index: 14, kind: output, shape index: {}]  }
   0x1   :  { %21 = vsyncpa [#allocation3 + $0x1], 0  ;;  %s2550_s29 = smov 0   ;;  %s2552_s30 = smov 0  }
   0x2   :  { %s2554_s15 = smov 0   ;;  %s2556_s16 = smov 0  }
   0x3 LB: > { %3016 = sst [smem:[#allocation5_spill]] %s2457_s29  ;;  %s2571_s17 = sadd.s32 4294967295, %s2469_s16   ;;  %s2469_s16 = sphi %s2556_s16, %s3025_s16   ;;  %s2465_s15 = sphi %s2554_s15, %s3027_s15   ;;  %s2461_s30 = sphi %s2552_s30, %s3029_s30   ;;  %s2457_s29 = sphi %s2550_s29, %s3028_s29  }
   0x4   : > { %3017 = sst [smem:[#allocation6_spill]] %s2465_s15  ;;  %s2036_s18 = sadd.s32 4294967294, %s2469_s16  }
   0x5   : > { %s2575_s19 = sadd.s32 1, %s2469_s16   ;;  %s338_s20 = sadd.s32 1, %s2465_s15 }
   0x6   : > { %3018 = sst [smem:[#allocation7_spill]] %s2575_s19  ;;  %s335_s21 = ssub.s32 %s2469_s16, %s2575_s19 }
   0x7   : > { %p348_p0 = scmp.ne.s32.totalorder %s2465_s15, %s2461_s30  ;;  %p336_p1 = scmp.eq.s32.totalorder %s335_s21, 0 }
   0x8   : > { %p349_p2 = scmp.eq.s32.totalorder %s2571_s17, 1  ;;  %p354_p3 = scmp.ne.s32.totalorder %s2461_s30, %s2457_s29 }
   0x9   : > { %p355_p4 = scmp.eq.s32.totalorder %s2036_s18, 1  ;;  %p2039_p7 = scmp.ge.s32.totalorder %s2469_s16, 1 }
   0xa   : > { %s2586_s22 = scalar_select %p336_p1, %s2465_s15, %s338_s20  }
   0xb   : > { %p2588_p5 = por %p349_p2, %p348_p0  ;;  %p2592_p6 = por %p355_p4, %p354_p3 }
   0xc   : > { %3019 = sst [smem:[#allocation8_spill]] %s2586_s22  ;;  %p422_p8 = scmp.lt.s32.totalorder %s2469_s16, 3 }
   0xd   : > { %s3021_s24 = scalar_select %p2592_p6, 1, 0 }
   0xe   : > { %p423_p9 = pnand %p2039_p7, %p422_p8 }
   0xf   : > { %3022 = sst [smem:[#allocation9_spill]] %s3021_s24  ;;  %v2305_v0 = vld [vmem:[%s2998_s2 + $0x4] ss:$48 sps:$4 sm:$0xff] (!%p423_p9)   ;;  %p470_p10 = scmp.lt.s32.totalorder (!%p423_p9), %s2571_s17, 1  ;;  %v2307_v1 = vld [vmem:[%s2998_s2 + $0xc] ss:$48 sps:$4 sm:$0xff] (!%p423_p9)   ;;  %v508_v28 = vlaneseq (!%p423_p9) }
  0x10   : > { %426 = sbr.rel (%p423_p9) target bundleno = 1876 (0x754), region = 76  ;;  %v2471_v2 = vmov (!%p423_p9), 0   ;;  %692 = vmatprep.subr.bf16.mxu0 (!%p423_p9), %v2305_v0  ;;  %v2309_v3 = vld [vmem:[%s2998_s2] ss:$48 sps:$4 sm:$0xff] (!%p423_p9)   ;;  %v2310_v4 = vld [vmem:[%s2998_s2 + $0x8] ss:$48 sps:$4 sm:$0xff] (!%p423_p9)   ;;  %733 = vmatprep.subr.bf16.mxu1 (!%p423_p9), %v2307_v1 }
  0x11   : > { %724 = vmatprep.mubr.bf16.mxu0 (!%p423_p9), %v2471_v2  ;;  %765 = vmatprep.mubr.bf16.mxu1 (!%p423_p9), %v2471_v2  ;;  %v2311_v5 = vld [vmem:[%s2998_s2 + $0x64] ss:$48 sps:$4 sm:$0xff] (!%p423_p9)   ;;  %v2313_v6 = vld [vmem:[%s2998_s2 + $0x6c] ss:$48 sps:$4 sm:$0xff] (!%p423_p9)   ;;  %v2315_v7 = vld [vmem:[%s2998_s2 + $0x60] ss:$48 sps:$4 sm:$0xff] (!%p423_p9)  }
  0x12   : > { %693 = vmatpush1.bf16.msra.mxu0 (!%p423_p9), %v2309_v3  ;;  %734 = vmatpush1.bf16.msra.mxu1 (!%p423_p9), %v2310_v4  ;;  %v2316_v8 = vld [vmem:[%s2998_s2 + $0x68] ss:$48 sps:$4 sm:$0xff] (!%p423_p9)   ;;  %v2317_v10 = vld [vmem:[%s2998_s2 + $0x10] ss:$48 sps:$4 sm:$0xff] (!%p423_p9)   ;;  %v2319_v11 = vld [vmem:[%s2998_s2 + $0x14] ss:$48 sps:$4 sm:$0xff] (!%p423_p9)  }
  0x13   : > { %694 = vmatprep.subr.bf16.mxu0 (!%p423_p9), %v2311_v5  ;;  %735 = vmatprep.subr.bf16.mxu1 (!%p423_p9), %v2313_v6  ;;  %v2320_v13 = vld [vmem:[%s2998_s2 + $0x18] ss:$48 sps:$4 sm:$0xff] (!%p423_p9)   ;;  %vm688_vm0 = vcmask (!%p423_p9), 261120   ;;  %v2322_v14 = vld [vmem:[%s2998_s2 + $0x1c] ss:$48 sps:$4 sm:$0xff] (!%p423_p9)   ;;  %v2472_v27 = vmov (!%p423_p9), 0.0  }
  0x14   : > { %v2325_v15 = vld [vmem:[%s2998_s2 + $0x74] ss:$48 sps:$4 sm:$0xff] (!%p423_p9)   ;;  %v2328_v16 = vld [vmem:[%s2998_s2 + $0x7c] ss:$48 sps:$4 sm:$0xff] (!%p423_p9)   ;;  %v2323_v17 = vld [vmem:[%s2998_s2 + $0x70] ss:$48 sps:$4 sm:$0xff] (!%p423_p9)  }
  0x15   : > { %v2326_v18 = vld [vmem:[%s2998_s2 + $0x78] ss:$48 sps:$4 sm:$0xff] (!%p423_p9)   ;;  %v2331_v19 = vld [vmem:[%s2998_s2 + $0x2c] ss:$48 sps:$4 sm:$0xff] (!%p423_p9)   ;;  %v2334_v20 = vld [vmem:[%s2998_s2 + $0x24] ss:$48 sps:$4 sm:$0xff] (!%p423_p9)  }
  0x16   : > { %695 = vmatpush1.bf16.msra.mxu0 (!%p423_p9), %v2315_v7  ;;  %736 = vmatpush1.bf16.msra.mxu1 (!%p423_p9), %v2316_v8  ;;  %v2329_v21 = vld [vmem:[%s2998_s2 + $0x28] ss:$48 sps:$4 sm:$0xff] (!%p423_p9)   ;;  %v2332_v22 = vld [vmem:[%s2998_s2 + $0x20] ss:$48 sps:$4 sm:$0xff] (!%p423_p9)   ;;  %v2337_v23 = vld [vmem:[%s2998_s2 + $0x8c] ss:$48 sps:$4 sm:$0xff] (!%p423_p9)  }
  0x17   : > { %s2612_s25 = scalar_select %p470_p10, %s2571_s17, 1  ;;  %774 = vmatprep.subr.bf16.mxu0 %v2319_v11  ;;  %815 = vmatprep.subr.bf16.mxu1 %v2322_v14  ;;  %v2340_v24 = vld [vmem:[%s2998_s2 + $0x84] ss:$48 sps:$4 sm:$0xff]   ;;  %v2335_v25 = vld [vmem:[%s2998_s2 + $0x88] ss:$48 sps:$4 sm:$0xff]   ;;  %v2690_v29 = vshrl.u32 %v508_v28, 7 }
  0x18   : > { %v2338_v26 = vld [vmem:[%s2998_s2 + $0x80] ss:$48 sps:$4 sm:$0xff]   ;;  %vm2473_vm1 = vmmov 0   ;;  %v2700_v31 = vld [vmem:[%s2999_s3 + $0x8] sm:$0xf]  ;;  %vm1191_vm2 = vcmask 1043456  }
  0x19   : > { %s2041_s22 = sshll.u32 %s2612_s25, 3  ;;  %v522_v30 = vsub.s32 3, %v2690_v29  ;;  %v514_v33 = vsub.s32 1, %v2690_v29  ;;  %v504_v34 = vld [vmem:[%s2999_s3] sm:$0xff]  ;;  %v2710_v35 = vsub.s32 0, %v2690_v29  ;;  %v526_v42 = vsub.s32 4, %v2690_v29  ;;  %s476_s20 = scalar_lea.vmem %s2997_s1, %s2612_s25 }
  0x1a   : > { %s473_s15 = scalar_lea.vmem %s2996_s0, %s2041_s22  ;;  %v538_v46 = vsub.s32 7, %v2690_v29  ;;  %v534_v50 = vsub.s32 6, %v2690_v29  ;;  %v518_v52 = vsub.s32 2, %v2690_v29  ;;  %vm1123_vm4 = vcmask 64512   ;;  %s467_s24 = sand.u32 1, %s2461_s30  }
  0x1b   : > { %v2630_v9 = vld [vmem:[%s473_s15] sm:$0xff]  ;;  %v2703_v32 = vrot.slane %v2700_v31, %v522_v30  ;;  %v515_v36 = vrot.slane %v504_v34, %v514_v33  ;;  %v511_v37 = vrot.slane %v504_v34, %v2710_v35  ;;  %v527_v53 = vrot.slane %v504_v34, %v526_v42  ;;  %s2040_s22 = sshll.u32 %s467_s24, 3  ;;  %s2124_s28 = sshll.u32 %s2571_s17, 7 }
  0x1c   : > { %v479_v12 = vpack.c.bf16 %v2630_v9, %v2630_v9  ;;  %v523_v54 = vrot.slane %v504_v34, %v522_v30  ;;  %v539_v55 = vrot.slane %v504_v34, %v538_v46  ;;  %v535_v57 = vrot.slane %v504_v34, %v534_v50  ;;  %s469_s18 = scalar_lea.vmem [#allocation2], %s2040_s22  ;;  %s2953_s29 = scalar_lea.hbm %s3010_s14, %s2124_s28 }
  0x1d   : > { %v519_v60 = vrot.slane %v504_v34, %v518_v52  ;;  %v543_v14 = vrot.slane %v2700_v31, %v2710_v35  ;;  %vm1868_vm5 = vcmask 523264   ;;  %s1968_s19 = sshll.u32 %s469_s18, 4  ;;  %s1955_s21 = scalar_lea.sflag [#allocation3], %s467_s24  ;;  %s2955_s19 = int_to_ptr.vmem [resolvable:$true] %s1968_s19 }
  0x1e   : > { %2066 = vmatmul.mubr.msk.bf16.vlgmr.msra.gmra.mrb[0].mxu0 %vm688_vm0, %v479_v12  ;;  %2067 = vmatmul.mubr.msk.bf16.vlgmr.msra.gmra.mrb[0].mxu1 %vm688_vm0, %v479_v12  ;;  %s2407_s15 = scalar_lea.vmem %s2955_s19, 128  ;;  %s2474_s17 = smov [#allocation2]  }
  0x1f   : > { %775 = vmatpush1.bf16.msra.mxu0 %v2317_v10  ;;  %816 = vmatpush1.bf16.msra.mxu1 %v2320_v13  ;;  %v530_v10 = vsub.s32 5, %v2690_v29  ;;  %v551_v13 = vrot.slane %v2700_v31, %v518_v52  ;;  %p2408_p11 = scmp.ne.s32.totalorder %s2955_s19, %s2407_s15  ;;  %s2411_s22 = sshll.u32 %s2474_s17, 4  ;;  %s2412_s22 = int_to_ptr.vmem [resolvable:$false] %s2411_s22 }
  0x20   : > { %776 = vmatprep.subr.bf16.mxu0 %v2325_v15  ;;  %817 = vmatprep.subr.bf16.mxu1 %v2328_v16  ;;  %v547_v16 = vrot.slane %v2700_v31, %v514_v33  ;;  %s2413_s26 = scalar_lea.vmem %s2412_s22, 256  ;;  %p2414_p0 = scmp.lt.s32.totalorder %s2955_s19, %s2412_s22 }
  0x21   : > { %806 = vmatprep.mubr.bf16.mxu0 %v2471_v2  ;;  %847 = vmatprep.mubr.bf16.mxu1 %v2471_v2  ;;  %p2409_p12 = pnand %p2408_p11, %p2588_p5  ;;  %p2415_p1 = scmp.lt.s32.totalorder %s2413_s26, %s2407_s15 }
  0x23   : > { %777 = vmatpush1.bf16.msra.mxu0 %v2323_v17  ;;  %818 = vmatpush1.bf16.msra.mxu1 %v2326_v18  ;;  %v531_v18 = vrot.slane %v504_v34, %v530_v10  ;;  %p2410_p13 = pneg %p2409_p12  ;;  %p2416_p2 = por %p2415_p1, %p2414_p0 }
  0x24   : > { %897 = vmatprep.subr.bf16.mxu1 %v2331_v19  ;;  %856 = vmatprep.subr.bf16.mxu0 %v2334_v20 }
  0x25   : > { %p2417_p3 = pnand %p2416_p2, %p2410_p13 }
  0x26   : > { %2068 = vmatmul.mubr.msk.bf16.vlgmr.msra.gmra.mrb[4].mxu0 %vm688_vm0, %v479_v12  ;;  %2069 = vmatmul.mubr.msk.bf16.vlgmr.msra.gmra.mrb[4].mxu1 %vm688_vm0, %v479_v12 }
  0x27   : > { %898 = vmatpush1.bf16.msra.mxu1 %v2329_v21  ;;  %857 = vmatpush1.bf16.msra.mxu0 %v2332_v22 }
  0x28   : > { %899 = vmatprep.subr.bf16.mxu1 %v2337_v23  ;;  %858 = vmatprep.subr.bf16.mxu0 %v2340_v24 }
  0x29   : > { %929 = vmatprep.mubr.bf16.mxu1 %v2471_v2  ;;  %888 = vmatprep.mubr.bf16.mxu0 %v2471_v2 }
  0x2b   : > { %900 = vmatpush1.bf16.msra.mxu1 %v2335_v25  ;;  %859 = vmatpush1.bf16.msra.mxu0 %v2338_v26 }
  0x2c   : > { %2195 = vmatprep.subr.bf16.mxu0 %v2472_v27  ;;  %2201 = vmatprep.subr.bf16.mxu1 %v2472_v27 }
  0x2e   : > { %2071 = vmatmul.mubr.msk.bf16.vlgmr.msra.gmra.mrb[8].mxu1 %vm688_vm0, %v479_v12  ;;  %2070 = vmatmul.mubr.msk.bf16.vlgmr.msra.gmra.mrb[8].mxu0 %vm688_vm0, %v479_v12 }
  0x2f   : > { %2197 = vmatprep.mubr.msk.bf16.mxu0 %vm2473_vm1, %v2472_v27  ;;  %2203 = vmatprep.mubr.msk.bf16.mxu1 %vm2473_vm1, %v2472_v27 }
  0xf1   : > { %v726_v38 = vpop.f32.mrb[0].mxu0  ;;  %v767_v39 = vpop.f32.mrb[0].mxu1 }
  0xf2   : > { %v728_v40 = vpop.f32.mrb[1].mxu0  ;;  %v769_v41 = vpop.f32.mrb[1].mxu1  ;;  %v727_v47 = vadd.f32 %v726_v38, %v511_v37  ;;  %v768_v12 = vadd.f32 %v767_v39, %v519_v60 }
  0xf3   : > { %v729_v43 = vadd.f32 %v728_v40, %v515_v36  ;;  %v730_v44 = vpop.f32.mrb[2].mxu0  ;;  %v771_v45 = vpop.f32.mrb[2].mxu1  ;;  %v770_v0 = vadd.f32 %v769_v41, %v523_v54 }
  0xf4   : > { %v731_v48 = vpop.f32.mrb[3].mxu0  ;;  %v772_v49 = vpop.f32.mrb[3].mxu1  ;;  %v938_v56 = vmul.f32 0.35355338, %v727_v47  ;;  %v950_v21 = vpack.c.bf16 %v768_v12, %v768_v12  ;;  %v954_v47 = vld [vmem:[%s476_s20] sm:$0x1] }
  0xf5   : > { %v946_v51 = vpack.c.bf16 %v729_v43, %v729_v43  ;;  %v939_v15 = vmul.f32 0.35355338, %v770_v0  ;;  %vm955_vm3 = vcmp.gt.f32.partialorder %v954_v47, 0.5  ;;  %v2345_v47 = vld [vmem:[%s3000_s4 + $0x50] sm:$0xff]  }
  0xf6   : > { %v942_v4 = vpack.c.bf16 %v938_v56, %v938_v56  ;;  %v1193_v42 = vsel %vm1191_vm2, %v950_v21, 0 }
  0xf7   : > { %2196 = vmatpush3.bf16.xpose.msra.mxu0 %v946_v51  ;;  %v943_v26 = vpack.c.bf16 %v939_v15, %v939_v15  ;;  %v956_v51 = vsel %vm955_vm3, -1e+09, %v2472_v27 }
  0xf8   : > { %2207 = vmatprep.subr.bf16.mxu0 %v2472_v27 }
  0xf9   : > { %v808_v58 = vpop.f32.mrb[4].mxu0  ;;  %v849_v59 = vpop.f32.mrb[4].mxu1 }
  0xfa   : > { %v809_v61 = vadd.f32 %v808_v58, %v527_v53  ;;  %v810_v62 = vpop.f32.mrb[5].mxu0  ;;  %v851_v63 = vpop.f32.mrb[5].mxu1  ;;  %v850_v6 = vadd.f32 %v849_v59, %v535_v57  ;;  %v961_v53 = vrot.slane %v956_v51, %v2710_v35  ;;  %v2349_v51 = vld [vmem:[%s3000_s4 + $0x58] sm:$0xff]  }
  0xfb   : > { %v852_v1 = vadd.f32 %v851_v63, %v539_v55  ;;  %v812_v2 = vpop.f32.mrb[6].mxu0  ;;  %v853_v3 = vpop.f32.mrb[6].mxu1  ;;  %v811_v34 = vadd.f32 %v810_v62, %v531_v18 }
  0xfc   : > { %v947_v5 = vpack.c.bf16 %v809_v61, %v809_v61  ;;  %v813_v7 = vpop.f32.mrb[7].mxu0  ;;  %v854_v8 = vpop.f32.mrb[7].mxu1  ;;  %v940_v17 = vmul.f32 0.35355338, %v850_v6 }
  0xfd   : > { %v948_v11 = vpack.c.bf16 %v852_v1, %v852_v1  ;;  %v951_v44 = vpack.c.bf16 %v811_v34, %v811_v34 }
  0xfe   : > { %2198 = vmatmul.mubr.bf16.vlgmr.msra.gmra.mrb[12].mxu0 %v942_v4  ;;  %2202 = vmatpush3.bf16.xpose.msra.mxu1 %v947_v5  ;;  %v944_v33 = vpack.c.bf16 %v940_v17, %v940_v17 }
  0xff   : > { %2208 = vmatpush3.bf16.xpose.msra.mxu0 %v948_v11  ;;  %2209 = vmatprep.mubr.msk.bf16.mxu0 %vm2473_vm1, %v2472_v27  ;;  %v1239_v46 = vsel %vm1191_vm2, %v951_v44, 0  ;;  %v2348_v44 = vld [vmem:[%s3000_s4 + $0x80] sm:$0xff]  }
 0x100   : > { %2213 = vmatprep.subr.bf16.mxu1 %v2472_v27  ;;  %2219 = vmatprep.subr.bf16.mxu0 %v2472_v27 }
 0x101   : > { %v931_v19 = vpop.f32.mrb[8].mxu1  ;;  %v890_v20 = vpop.f32.mrb[8].mxu0 }
 0x102   : > { %v932_v22 = vadd.f32 %v931_v19, %v551_v13  ;;  %v933_v23 = vpop.f32.mrb[9].mxu1  ;;  %v891_v24 = vadd.f32 %v890_v20, %v543_v14  ;;  %v892_v25 = vpop.f32.mrb[9].mxu0 }
 0x103   : > { %v934_v28 = vadd.f32 %v933_v23, %v2703_v32  ;;  %v935_v29 = vpop.f32.mrb[10].mxu1  ;;  %v893_v30 = vadd.f32 %v892_v25, %v547_v16  ;;  %v894_v31 = vpop.f32.mrb[10].mxu0 }
 0x104   : > { %v949_v36 = vpack.c.bf16 %v932_v22, %v932_v22  ;;  %v952_v37 = vpack.c.bf16 %v891_v24, %v891_v24  ;;  %v936_v38 = vpop.f32.mrb[11].mxu1  ;;  %v895_v39 = vpop.f32.mrb[11].mxu0 }
 0x105   : > { %v953_v40 = vpack.c.bf16 %v934_v28, %v934_v28  ;;  %v941_v41 = vmul.f32 0.35355338, %v893_v30  ;;  %2204 = vmatmul.mubr.bf16.vlgmr.msra.gmra.mrb[12].mxu1 %v943_v26 }
 0x106   : > { %v2730_v43 = vsel %vm1191_vm2, %v952_v37, 0  ;;  %2210 = vmatmul.mubr.bf16.vlgmr.msra.gmra.mrb[16].mxu0 %v944_v33  ;;  %2214 = vmatpush3.bf16.xpose.msra.mxu1 %v949_v36 }
 0x107   : > { %v2733_v32 = vsel %vm1191_vm2, %v953_v40, 0  ;;  %2220 = vmatpush3.bf16.msra.mxu0 %v1193_v42  ;;  %2215 = vmatprep.mubr.msk.bf16.mxu1 %vm2473_vm1, %v2472_v27  ;;  %v945_v45 = vpack.c.bf16 %v941_v41, %v941_v41  ;;  %v2341_v41 = vld [vmem:[%s3000_s4 + $0x40] sm:$0xff]  }
 0x108   : > { %2225 = vmatprep.subr.bf16.mxu1 %v2472_v27  ;;  %2221 = vmatprep.mubr.msk.bf16.mxu0 %vm2473_vm1, %v2472_v27  ;;  %v2342_v42 = vld [vmem:[%s3000_s4] sm:$0xff]  }
 0x109   : > { %2231 = vmatprep.subr.bf16.mxu0 %v2472_v27 }
 0x10d   : > { %2216 = vmatmul.mubr.bf16.vlgmr.msra.gmra.mrb[16].mxu1 %v945_v45  ;;  %v2344_v45 = vld [vmem:[%s3000_s4 + $0x8] sm:$0xff]  }
 0x10e   : > { %2226 = vmatpush3.bf16.msra.mxu1 %v1239_v46  ;;  %2227 = vmatprep.mubr.msk.bf16.mxu1 %vm2473_vm1, %v2472_v27  ;;  %v2350_v46 = vld [vmem:[%s3000_s4 + $0xc8] sm:$0xff]  }
 0x10f   : > { %2237 = vmatprep.subr.bf16.mxu1 %v2472_v27 }
 0x1d1   : > { %v997_v48 = vpop.f32.mrb[12].mxu0 }
 0x1d2   : > { %v2199_v49 = vpop.f32.mrb[13].mxu0  ;;  %v998_v60 = vadd.f32 %v997_v48, %v961_v53  ;;  %v2352_v48 = vld [vmem:[%s3000_s4 + $0x88] sm:$0xff]  }
 0x1d3   : > { %v1000_v50 = vpop.f32.mrb[14].mxu0  ;;  %v2354_v49 = vld [vmem:[%s3000_s4 + $0xd0] sm:$0xff]  }
 0x1d4   : > { %v2200_v52 = vpop.f32.mrb[15].mxu0  ;;  %v1124_v1 = vsel %vm1123_vm4, %v998_v60, -inf  ;;  %v2347_v50 = vld [vmem:[%s3000_s4 + $0x10] sm:$0xff]  }
 0x1d5   : > { %v2356_v52 = vld [vmem:[%s3000_s4 + $0x90] sm:$0xff]  }
 0x1d8   : > { %v1037_v54 = vpop.f32.mrb[12].mxu1 }
 0x1d9   : > { %v1038_v55 = vadd.f32 %v1037_v54, %v961_v53  ;;  %v2205_v56 = vpop.f32.mrb[13].mxu1  ;;  %v1077_v57 = vpop.f32.mrb[16].mxu0  ;;  %v2351_v54 = vld [vmem:[%s3000_s4 + $0x18] sm:$0xff]  }
 0x1da   : > { %v1040_v58 = vpop.f32.mrb[14].mxu1  ;;  %v2211_v59 = vpop.f32.mrb[17].mxu0  ;;  %v1078_v5 = vadd.f32 %v1077_v57, %v961_v53  ;;  %v2355_v56 = vld [vmem:[%s3000_s4 + $0x20] sm:$0xff]   ;;  %v2357_v57 = vld [vmem:[%s3000_s4 + $0x68] sm:$0xff]  }
 0x1db   : > { %v2206_v61 = vpop.f32.mrb[15].mxu1  ;;  %v1080_v62 = vpop.f32.mrb[18].mxu0  ;;  %v1127_v63 = vsel %vm1123_vm4, %v1038_v55, -inf  ;;  %v2359_v58 = vld [vmem:[%s3000_s4 + $0x28] sm:$0xff]   ;;  %v2360_v59 = vld [vmem:[%s3000_s4 + $0x98] sm:$0xff]  }
 0x1dc   : > { %1128 = vmax.xlane.f32.xlu0 %v1127_v63  ;;  %v2212_v0 = vpop.f32.mrb[19].mxu0  ;;  %v1130_v8 = vsel %vm1123_vm4, %v1078_v5, -inf  ;;  %v2362_v61 = vld [vmem:[%s3000_s4 + $0xe0] sm:$0xff]   ;;  %v2363_v62 = vld [vmem:[%s3000_s4 + $0x30] sm:$0xff]  }
 0x1dd   : > { %v2364_v63 = vld [vmem:[%s3000_s4 + $0xa0] sm:$0xff]   ;;  %v2365_v0 = vld [vmem:[%s3000_s4 + $0x78] sm:$0xff]  }
 0x1e0   : > { %v1117_v2 = vpop.f32.mrb[16].mxu1  ;;  %1125 = vmax.xlane.f32.xlu0 %v1124_v1  ;;  %v2366_v1 = vld [vmem:[%s3000_s4 + $0xe8] sm:$0xff]  }
 0x1e1   : > { %v1118_v3 = vadd.f32 %v1117_v2, %v961_v53  ;;  %v2217_v35 = vpop.f32.mrb[17].mxu1  ;;  %v2358_v53 = vld [vmem:[%s3000_s4 + $0xd8] sm:$0xff]  }
 0x1e2   : > { %v1120_v4 = vpop.f32.mrb[18].mxu1  ;;  %v2367_v2 = vld [vmem:[%s3000_s4 + $0x38] sm:$0xff]   ;;  %v2369_v35 = vld [vmem:[%s3000_s4 + $0xf0] sm:$0xff]  }
 0x1e3   : > { %v2218_v6 = vpop.f32.mrb[19].mxu1  ;;  %v1133_v7 = vsel %vm1123_vm4, %v1118_v3, -inf  ;;  %v2370_v4 = vld [vmem:[%s3000_s4 + $0xb0] sm:$0xff]  }
 0x1e4   : > { %1134 = vmax.xlane.f32.xlu1 %v1133_v7  ;;  %v2372_v6 = vld [vmem:[%s3000_s4 + $0xb8] sm:$0xff]  }
 0x1e8   : > { %1131 = vmax.xlane.f32.xlu1 %v1130_v8 }
 0x269   : > { %v2755_v10 = vpop.xlane.xlu0 %1128 }
 0x26a   : > { %v1137_v11 = vmax.f32 %v2755_v10, -1e+30 }
 0x26c   : > { %v1153_v12 = vsub.f32 %v1038_v55, %v1137_v11  ;;  %v2353_v55 = vld [vmem:[%s3000_s4 + $0x60] sm:$0xff]   ;;  %v1141_v7 = vsub.f32 -1e+30, %v1137_v11 }
 0x26d   : > { %v2760_v13 = vpop.xlane.xlu0 %1125 }
 0x26e   : > { %v1158_v14 = vmul.f32 1.442695, %v1153_v12  ;;  %v1136_v15 = vmax.f32 %v2760_v13, -1e+30  ;;  %v1146_v8 = vmul.f32 1.442695, %v1141_v7 }
 0x270   : > { %v1152_v16 = vsub.f32 %v998_v60, %v1136_v15  ;;  %2379 = vpow2.f32 %v1158_v14  ;;  %v2361_v60 = vld [vmem:[%s3000_s4 + $0x70] sm:$0xff]   ;;  %v1140_v12 = vsub.f32 -1e+30, %v1136_v15 }
 0x271   : > { %v2765_v17 = vpop.xlane.xlu1 %1134 }
 0x272   : > { %v1156_v18 = vmul.f32 1.442695, %v1152_v16  ;;  %v1139_v19 = vmax.f32 %v2765_v17, -1e+30  ;;  %v1144_v14 = vmul.f32 1.442695, %v1140_v12 }
 0x274   : > { %v1155_v20 = vsub.f32 %v1118_v3, %v1139_v19  ;;  %2381 = vpow2.f32 %v1156_v18  ;;  %v2368_v3 = vld [vmem:[%s3000_s4 + $0xa8] sm:$0xff]   ;;  %v1143_v16 = vsub.f32 -1e+30, %v1139_v19 }
 0x275   : > { %v2770_v21 = vpop.xlane.xlu1 %1131 }
 0x276   : > { %v1162_v22 = vmul.f32 1.442695, %v1155_v20  ;;  %v1138_v23 = vmax.f32 %v2770_v21, -1e+30  ;;  %v1150_v18 = vmul.f32 1.442695, %v1143_v16 }
 0x278   : > { %v1154_v24 = vsub.f32 %v1078_v5, %v1138_v23  ;;  %2383 = vpow2.f32 %v1162_v22  ;;  %v2371_v5 = vld [vmem:[%s3000_s4 + $0xf8] sm:$0xff]   ;;  %v1142_v20 = vsub.f32 -1e+30, %v1138_v23 }
 0x27a   : > { %v1160_v25 = vmul.f32 1.442695, %v1154_v24  ;;  %v2380_v26 = vpop.eup %2379  ;;  %v1148_v22 = vmul.f32 1.442695, %v1142_v20 }
 0x27b   : > { %v1171_v28 = vsel %vm1123_vm4, %v2380_v26, 0.0  ;;  %v1185_v29 = vpack.c.bf16 %v2380_v26, %v2380_v26 }
 0x27c   : > { %2385 = vpow2.f32 %v1160_v25  ;;  %1172 = vadd.xlane.f32.xlu0 %v1171_v28 }
 0x27d   : > { %2228 = vmatmul.mubr.msk.bf16.vlgmr.msra.gmra.mrb[20].mxu1 %vm1123_vm4, %v1185_v29  ;;  %2387 = vpow2.f32 %v1146_v8 }
 0x27e   : > { %v2382_v30 = vpop.eup %2381  ;;  %2238 = vmatpush3.bf16.msra.mxu1 %v2733_v32  ;;  %2239 = vmatprep.mubr.msk.bf16.mxu1 %vm2473_vm1, %v2472_v27  ;;  %v2346_v32 = vld [vmem:[%s3000_s4 + $0xc0] sm:$0xff]   ;;  %2389 = vpow2.f32 %v1144_v14 }
 0x27f   : > { %v1168_v31 = vsel %vm1123_vm4, %v2382_v30, 0.0  ;;  %v1184_v33 = vpack.c.bf16 %v2382_v30, %v2382_v30  ;;  %2165 = vmatprep.subr.bf16.mxu1 %v2346_v32  ;;  %2391 = vpow2.f32 %v1150_v18 }
 0x280   : > { %1169 = vadd.xlane.f32.xlu0 %v1168_v31  ;;  %2393 = vpow2.f32 %v1148_v22 }
 0x281   : > { %2222 = vmatmul.mubr.msk.bf16.vlgmr.msra.gmra.mrb[20].mxu0 %vm1123_vm4, %v1184_v33 }
 0x282   : > { %v2384_v36 = vpop.eup %2383  ;;  %2232 = vmatpush3.bf16.msra.mxu0 %v2730_v43  ;;  %2233 = vmatprep.mubr.msk.bf16.mxu0 %vm2473_vm1, %v2472_v27  ;;  %v2343_v43 = vld [vmem:[%s3000_s4 + $0x48] sm:$0xff]  }
 0x283   : > { %v1177_v37 = vsel %vm1123_vm4, %v2384_v36, 0.0  ;;  %v1187_v38 = vpack.c.bf16 %v2384_v36, %v2384_v36  ;;  %2143 = vmatprep.subr.bf16.mxu0 %v2341_v41 }
 0x284   : > { %1178 = vadd.xlane.f32.xlu1 %v1177_v37 }
 0x285   : > { %2240 = vmatmul.mubr.msk.bf16.vlgmr.msra.gmra.mrb[24].mxu1 %vm1123_vm4, %v1187_v38 }
 0x286   : > { %v2386_v39 = vpop.eup %2385  ;;  %2166 = vmatpush3.bf16.msra.mxu1 %v2348_v44 }
 0x287   : > { %v1174_v34 = vsel %vm1123_vm4, %v2386_v39, 0.0  ;;  %v1186_v40 = vpack.c.bf16 %v2386_v39, %v2386_v39  ;;  %2167 = vmatprep.subr.bf16.mxu1 %v2350_v46  ;;  %v2388_v24 = vpop.eup %2387 }
 0x288   : > { %1175 = vadd.xlane.f32.xlu1 %v1174_v34  ;;  %v1165_v10 = vmul.f32 0.0, %v2388_v24  ;;  %v2390_v11 = vpop.eup %2389 }
 0x289   : > { %2234 = vmatmul.mubr.msk.bf16.vlgmr.msra.gmra.mrb[24].mxu0 %vm1123_vm4, %v1186_v40  ;;  %v1164_v15 = vmul.f32 0.0, %v2390_v11  ;;  %v2392_v28 = vpop.eup %2391  ;;  %v2373_v11 = vld [vmem:[%s3002_s6] sm:$0xff]  }
 0x28a   : > { %2144 = vmatpush3.bf16.msra.mxu0 %v2342_v42  ;;  %2168 = vmatpush3.bf16.msra.mxu1 %v2352_v48  ;;  %v1167_v19 = vmul.f32 0.0, %v2392_v28  ;;  %v2394_v30 = vpop.eup %2393 }
 0x28b   : > { %2145 = vmatprep.subr.bf16.mxu0 %v2343_v43  ;;  %2169 = vmatprep.subr.bf16.mxu1 %v2354_v49  ;;  %v1166_v23 = vmul.f32 0.0, %v2394_v30 }
 0x28e   : > { %2146 = vmatpush3.bf16.msra.mxu0 %v2344_v45  ;;  %2170 = vmatpush3.bf16.msra.mxu1 %v2356_v52 }
 0x28f   : > { %2147 = vmatprep.subr.bf16.mxu0 %v2345_v47  ;;  %2171 = vmatprep.subr.bf16.mxu1 %v2358_v53 }
 0x292   : > { %2148 = vmatpush3.bf16.msra.mxu0 %v2347_v50  ;;  %2172 = vmatpush3.bf16.msra.mxu1 %v2360_v59 }
 0x293   : > { %2149 = vmatprep.subr.bf16.mxu0 %v2349_v51  ;;  %2173 = vmatprep.subr.bf16.mxu1 %v2362_v61 }
 0x296   : > { %2150 = vmatpush3.bf16.msra.mxu0 %v2351_v54  ;;  %2174 = vmatpush3.bf16.msra.mxu1 %v2364_v63 }
 0x297   : > { %2151 = vmatprep.subr.bf16.mxu0 %v2353_v55  ;;  %2175 = vmatprep.subr.bf16.mxu1 %v2366_v1 }
 0x29a   : > { %2152 = vmatpush3.bf16.msra.mxu0 %v2355_v56  ;;  %2176 = vmatpush3.bf16.msra.mxu1 %v2368_v3 }
 0x29b   : > { %2153 = vmatprep.subr.bf16.mxu0 %v2357_v57  ;;  %2177 = vmatprep.subr.bf16.mxu1 %v2369_v35 }
 0x29e   : > { %2154 = vmatpush3.bf16.msra.mxu0 %v2359_v58  ;;  %2178 = vmatpush3.bf16.msra.mxu1 %v2370_v4 }
 0x29f   : > { %2155 = vmatprep.subr.bf16.mxu0 %v2361_v60  ;;  %2179 = vmatprep.subr.bf16.mxu1 %v2371_v5 }
 0x2a2   : > { %2156 = vmatpush3.bf16.msra.mxu0 %v2363_v62  ;;  %2180 = vmatpush3.bf16.msra.mxu1 %v2372_v6  ;;  %v2076_v6 = vld [vmem:[%s3001_s5] ss:$0 sm:$0xff] }
 0x2a3   : > { %2157 = vmatprep.subr.bf16.mxu0 %v2365_v0  ;;  %2251 = vmatprep.subr.bf16.mxu1 %v2472_v27  ;;  %v1392_v12 = vadd.f32 %v2076_v6, %v2630_v9  ;;  %v2374_v9 = vld [vmem:[%s3002_s6 + $0x8] sm:$0xff]   ;;  %v2122_v6 = vld [vmem:[%s3009_s13] ss:$0 sm:$0xff] }
 0x2a6   : > { %2158 = vmatpush3.bf16.msra.mxu0 %v2367_v2 }
 0x2a7   : > { %2243 = vmatprep.subr.bf16.mxu0 %v2472_v27 }
 0x309   : > { %v1173_v25 = vpop.xlane.xlu0 %1172 }
 0x30a   : > { %v1181_v26 = vadd.f32 %v1173_v25, %v1165_v10 }
 0x30c   : > { %2395 = vrcp.f32 %v1181_v26  ;;  %v2375_v26 = vld [vmem:[%s3004_s8] sm:$0xff]  }
 0x30d   : > { %v1170_v13 = vpop.xlane.xlu0 %1169 }
 0x30e   : > { %v1180_v17 = vadd.f32 %v1170_v13, %v1164_v15  ;;  %v2376_v13 = vld [vmem:[%s3004_s8 + $0x8] sm:$0xff]  }
 0x310   : > { %2397 = vrcp.f32 %v1180_v17 }
 0x311   : > { %v1179_v29 = vpop.xlane.xlu1 %1178 }
 0x312   : > { %v1183_v31 = vadd.f32 %v1179_v29, %v1167_v19 }
 0x314   : > { %2399 = vrcp.f32 %v1183_v31 }
 0x315   : > { %v1176_v21 = vpop.xlane.xlu1 %1175 }
 0x316   : > { %v1182_v33 = vadd.f32 %v1176_v21, %v1166_v23  ;;  %v2396_v39 = vpop.eup %2395 }
 0x318   : > { %2401 = vrcp.f32 %v1182_v33 }
 0x31a   : > { %v2398_v45 = vpop.eup %2397 }
 0x31e   : > { %v2400_v53 = vpop.eup %2399 }
 0x322   : > { %v2402_v61 = vpop.eup %2401 }
 0x350   : > { %v1275_v36 = vpop.f32.mrb[20].mxu1 }
 0x351   : > { %v1374_v37 = vadd.f32 %v1275_v36, %v1165_v10  ;;  %v2229_v38 = vpop.f32.mrb[21].mxu1  ;;  %v2109_v36 = vld [vmem:[%s3006_s10] ss:$0 sm:$0xff] }
 0x352   : > { %v1278_v34 = vpop.f32.mrb[22].mxu1  ;;  %v2110_v38 = vld [vmem:[%s3007_s11] ss:$0 sm:$0xff] }
 0x353   : > { %v1382_v40 = vmul.f32 %v2396_v39, %v1374_v37  ;;  %v2230_v41 = vpop.f32.mrb[23].mxu1 }
 0x354   : > { %v1229_v42 = vpop.f32.mrb[20].mxu0  ;;  %v2377_v41 = vld [vmem:[%s3004_s8 + $0x10] sm:$0xff]  }
 0x355   : > { %v1394_v43 = vpack.c.bf16 %v1382_v40, %v1382_v40  ;;  %v1373_v32 = vadd.f32 %v1229_v42, %v1164_v15  ;;  %v2223_v44 = vpop.f32.mrb[21].mxu0  ;;  %v2378_v42 = vld [vmem:[%s3004_s8 + $0x18] sm:$0xff]  }
 0x356   : > { %v1232_v46 = vpop.f32.mrb[22].mxu0 }
 0x357   : > { %v1381_v47 = vmul.f32 %v2398_v45, %v1373_v32  ;;  %v2224_v48 = vpop.f32.mrb[23].mxu0  ;;  %1685 = vmatprep.mubr.bf16.mxu0 %v1394_v43  ;;  %v2111_v43 = vld [vmem:[%s3003_s7] ss:$0 sm:$0xff] }
 0x358   : > { %v1367_v49 = vpop.f32.mrb[24].mxu1 }
 0x359   : > { %v1393_v50 = vpack.c.bf16 %v1381_v47, %v1381_v47  ;;  %v1376_v51 = vadd.f32 %v1367_v49, %v1167_v19  ;;  %v2241_v52 = vpop.f32.mrb[25].mxu1 }
 0x35a   : > { %v1370_v54 = vpop.f32.mrb[26].mxu1 }
 0x35b   : > { %v1384_v55 = vmul.f32 %v2400_v53, %v1376_v51  ;;  %v2242_v56 = vpop.f32.mrb[27].mxu1  ;;  %1686 = vmatmul.mubr.bf16.vlgmr.msra.gmra.mrb[28].mxu0 %v1393_v50 }
 0x35c   : > { %v1321_v57 = vpop.f32.mrb[24].mxu0  ;;  %2247 = vmatprep.mubr.msk.bf16.mxu0 %vm2473_vm1, %v2472_v27  ;;  %2244 = vmatpush3.bf16.msra.mxu0 %v2373_v11 }
 0x35d   : > { %v1396_v58 = vpack.c.bf16 %v1384_v55, %v1384_v55  ;;  %v1375_v59 = vadd.f32 %v1321_v57, %v1166_v23  ;;  %v2235_v60 = vpop.f32.mrb[25].mxu0  ;;  %2245 = vmatprep.subr.bf16.mxu0 %v2472_v27 }
 0x35e   : > { %v1324_v62 = vpop.f32.mrb[26].mxu0 }
 0x35f   : > { %v1383_v63 = vmul.f32 %v2402_v61, %v1375_v59  ;;  %v2236_v0 = vpop.f32.mrb[27].mxu0  ;;  %1725 = vmatprep.mubr.bf16.mxu1 %v1396_v58 }
 0x360   : > { %2246 = vmatpush3.bf16.msra.mxu0 %v2374_v9 }
 0x361   : > { %v1395_v1 = vpack.c.bf16 %v1383_v63, %v1383_v63 }
 0x363   : > { %1726 = vmatmul.mubr.bf16.vlgmr.msra.gmra.mrb[28].mxu1 %v1395_v1 }
 0x364   : > { %2259 = vmatprep.mubr.msk.bf16.mxu1 %vm2473_vm1, %v2472_v27  ;;  %2252 = vmatpush3.bf16.msra.mxu1 %v2375_v26 }
 0x365   : > { %2253 = vmatprep.subr.bf16.mxu1 %v2472_v27 }
 0x368   : > { %2254 = vmatpush3.bf16.msra.mxu1 %v2376_v13 }
 0x369   : > { %2255 = vmatprep.subr.bf16.mxu1 %v2472_v27 }
 0x36c   : > { %2256 = vmatpush3.bf16.msra.mxu1 %v2377_v41 }
 0x36d   : > { %2257 = vmatprep.subr.bf16.mxu1 %v2472_v27  ;;  %v2120_v27 = vld [vmem:[%s3005_s9] ss:$0 sm:$0xff] }
 0x370   : > { %2258 = vmatpush3.bf16.msra.mxu1 %v2378_v42 }
 0x42e   : > { %v2159_v2 = vpop.f32.mrb[28].mxu0 }
 0x42f   : > { %v2160_v3 = vpop.f32.mrb[29].mxu0 }
 0x430   : > { %v2161_v35 = vadd.f32 %v2160_v3, %v2159_v2  ;;  %v2162_v4 = vpop.f32.mrb[30].mxu0 }
 0x431   : > { %v2163_v5 = vpop.f32.mrb[31].mxu0  ;;  %v2121_v4 = vld [vmem:[%s3008_s12] ss:$0 sm:$0xff] }
 0x436   : > { %v2181_v7 = vpop.f32.mrb[28].mxu1 }
 0x437   : > { %v2182_v8 = vpop.f32.mrb[29].mxu1 }
 0x438   : > { %v2183_v14 = vadd.f32 %v2182_v8, %v2181_v7  ;;  %v2184_v16 = vpop.f32.mrb[30].mxu1 }
 0x439   : > { %v2185_v18 = vpop.f32.mrb[31].mxu1 }
 0x43a   : > { %v1728_v20 = vadd.f32 %v2183_v14, %v2161_v35 }
 0x43c   : > { %v1733_v22 = vadd.f32 %v1728_v20, %v1392_v12 }
 0x43e   : > { %v1734_v24 = vsel %vm688_vm0, %v1733_v22, 0.0  ;;  %v1739_v25 = vmul.f32 %v1733_v22, %v1733_v22 }
 0x43f   : > { %1735 = vadd.xlane.f32.xlu0 %v1734_v24 }
 0x440   : > { %v1740_v10 = vsel %vm688_vm0, %v1739_v25, 0.0 }
 0x441   : > { %1741 = vadd.xlane.f32.xlu1 %v1740_v10 }
 0x4cc   : > { %v1736_v15 = vpop.xlane.xlu0 %1735 }
 0x4cd   : > { %v1738_v28 = vmul.f32 0.03125, %v1736_v15 }
 0x4ce   : > { %v1742_v29 = vpop.xlane.xlu1 %1741 }
 0x4cf   : > { %v1744_v17 = vmul.f32 %v1738_v28, %v1738_v28  ;;  %v1743_v19 = vmul.f32 0.03125, %v1742_v29  ;;  %v1747_v23 = vsub.f32 %v1733_v22, %v1738_v28 }
 0x4d1   : > { %v1745_v30 = vsub.f32 %v1743_v19, %v1744_v17 }
 0x4d3   : > { %v1746_v31 = vmax.f32 %v1745_v30, 0.0 }
 0x4d5   : > { %v1748_v21 = vadd.f32 1e-09, %v1746_v31 }
 0x4d7   : > { %2403 = vrsqrt.f32 %v1748_v21 }
 0x4e1   : > { %v2404_v33 = vpop.eup %2403 }
 0x4e2   : > { %v1750_v37 = vmul.f32 %v2404_v33, %v1747_v23 }
 0x4e4   : > { %v1758_v39 = vmul.f32 %v2109_v36, %v1750_v37 }
 0x4e6   : > { %v1766_v34 = vadd.f32 %v2110_v38, %v1758_v39 }
 0x4e8   : > { %v1767_v40 = vpack.c.bf16 %v1766_v34, %v1766_v34 }
 0x4ea   : > { %2248 = vmatmul.mubr.msk.bf16.vlgmr.msra.gmra.mrb[32].mxu0 %vm688_vm0, %v1767_v40 }
 0x5bd   : > { %v1828_v32 = vpop.f32.mrb[32].mxu0 }
 0x5be   : > { %v1829_v44 = vadd.f32 %v2111_v43, %v1828_v32  ;;  %v2249_v45 = vpop.f32.mrb[33].mxu0 }
 0x5bf   : > { %v1831_v46 = vpop.f32.mrb[34].mxu0 }
 0x5c0   : > { %v1834_v47 = vmax.f32 %v1829_v44, 0.0  ;;  %v2250_v48 = vpop.f32.mrb[35].mxu0 }
 0x5c2   : > { %v1835_v49 = vpack.c.bf16 %v1834_v47, %v1834_v47 }
 0x5c4   : > { %2260 = vmatmul.mubr.msk.bf16.vlgmr.msra.gmra.mrb[32].mxu1 %vm1868_vm5, %v1835_v49 }
 0x697   : > { %v1906_v50 = vpop.f32.mrb[32].mxu1 }
 0x698   : > { %v1912_v51 = vadd.f32 %v1906_v50, %v1766_v34  ;;  %v2261_v52 = vpop.f32.mrb[33].mxu1 }
 0x699   : > { %v1909_v53 = vpop.f32.mrb[34].mxu1 }
 0x69a   : > { %v1920_v54 = vadd.f32 %v2120_v27, %v1912_v51  ;;  %v2262_v55 = vpop.f32.mrb[35].mxu1 }
 0x69c   : > { %v1921_v56 = vsel %vm688_vm0, %v1920_v54, 0.0  ;;  %v1925_v57 = vmul.f32 %v1920_v54, %v1920_v54 }
 0x69d   : > { %1922 = vadd.xlane.f32.xlu0 %v1921_v56 }
 0x69e   : > { %v1926_v58 = vsel %vm688_vm0, %v1925_v57, 0.0 }
 0x69f   : > { %1927 = vadd.xlane.f32.xlu1 %v1926_v58 }
 0x72a   : > { %v1923_v59 = vpop.xlane.xlu0 %1922 }
 0x72b   : > { %v1924_v60 = vmul.f32 0.03125, %v1923_v59 }
 0x72c   : > { %v1928_v61 = vpop.xlane.xlu1 %1927 }
 0x72d   : > { %v1930_v62 = vmul.f32 %v1924_v60, %v1924_v60  ;;  %v1929_v63 = vmul.f32 0.03125, %v1928_v61  ;;  %v1933_v3 = vsub.f32 %v1920_v54, %v1924_v60 }
 0x72f   : > { %v1931_v0 = vsub.f32 %v1929_v63, %v1930_v62 }
 0x731   : > { %v1932_v1 = vmax.f32 %v1931_v0, 0.0 }
 0x733   : > { %v1934_v2 = vadd.f32 1e-09, %v1932_v1 }
 0x735   : > { %2405 = vrsqrt.f32 %v1934_v2 }
 0x73f   : > { %v2406_v35 = vpop.eup %2405 }
 0x740   : > { %v1936_v5 = vmul.f32 %v2406_v35, %v1933_v3 }
 0x742   : > { %v1944_v7 = vmul.f32 %v2121_v4, %v1936_v5 }
 0x744   : > { %v1952_v8 = vadd.f32 %v2122_v6, %v1944_v7 }
 0x746   : > { %1953 = vst.msk [vmem:[%s469_s18] sm:$0xff] %vm688_vm0, %v1952_v8 }
 0x747   : > { %2420 = shalt.err (!%p2417_p3)
}
 0x748   : > { %s2421_s24 = scalar_lea.hbm %s2953_s29, 128  ;;  %s2425_s18 = scalar_lea.hbm %s3010_s14, 256 }
 0x749   : > { %p2422_p4 = scmp.ne.s32.totalorder %s2953_s29, %s2421_s24  ;;  %p2426_p9 = scmp.lt.u32.totalorder %s2953_s29, %s3010_s14 }
 0x74a   : > { %p2427_p10 = scmp.lt.u32.totalorder %s2425_s18, %s2421_s24  ;;  %p2429_p12 = scmp.lt.u32.totalorder %s2421_s24, %s2953_s29 }
 0x74b   : > { %p2423_p7 = pnand %p2422_p4, %p2588_p5 }
 0x74c   : > { %p2428_p11 = por %p2427_p10, %p2426_p9 }
 0x74d   : > { %p2424_p8 = pneg %p2423_p7 }
 0x74e   : > { %p2430_p13 = por %p2429_p12, %p2428_p11 }
 0x750   : > { %p2431_p0 = pnand %p2430_p13, %p2424_p8 }
 0x752   : > { %2434 = shalt.err (!%p2431_p0)
}
 0x753   : > { %2263 = dma.vmem_to_hbm [thread:$0]  (%p2588_p5), %s2955_s19, 128, %s2953_s29, %s1955_s21  }
 0x754 PF: > { %s3023_s15 = sld [smem:[#allocation5_spill]]  ;;  %p2269_p1 = scmp.ge.s32.totalorder %s2469_s16, 2 }
 0x756   : > { %p2266_p2 = pnand %p2269_p1, %p2592_p6 }
 0x75a   : > { %s1980_s22 = sand.u32 1, %s3023_s15  }
 0x75b   : > { %s1981_s26 = scalar_lea.sflag [#allocation3], %s1980_s22 }
 0x75c   : > { %2452 = dma.done.wait (!%p2266_p2), %s1981_s26, 128  }
 0x75d   : > { %2454 = vsyncadd (!%p2266_p2), %s1981_s26, 4294967168  ;;  %s3025_s16 = sld [smem:[#allocation7_spill]]  ;;  %s3026_s24 = sld [smem:[#allocation6_spill]] }
 0x75e   : > { %s3027_s15 = sld [smem:[#allocation8_spill]]  ;;  %s3028_s29 = smov %s2461_s30 }
 0x763   : > { %p24_p3 = scmp.ge.s32.totalorder %s3025_s16, 4   ;;  %s3029_s30 = smov %s3026_s24 }
 0x765   :  { %26 = sbr.rel (!%p24_p3) target bundleno = 3 (0x3), region = 114 }
 0x76c   :  { %1986 = vsyncpa [#allocation3], 1 }
 0x76d   :  { %1988 = vsyncpa [#allocation3 + $0x1], 1 }

</bundles_post_ra>
